<compile_context>
chip_gen: v5e
topology: v5e:2x2
jax: 0.10.0
libtpu: 0.0.40
codegen_flags: <defaults>
</compile_context>

<pallas_src>
import functools

import jax
import jax.numpy as jnp
from jax import lax
from jax.experimental import pallas as pl
from jax.experimental.pallas import tpu as pltpu


def _round_up(v, m):
    return ((v + m - 1) // m) * m


def _bce_loss_kernel(x_ref, y_ref, out_ref, acc_ref, *, tile_b, tile_n,
                     n_rows, n_cols, need_row_mask, need_col_mask):
    # x_ref: (tile_b, tile_n) native dtype VMEM, y_ref: (tile_b, 1) f32 VMEM,
    # out_ref: (1, 8, 128) f32 per-B-tile partial, acc_ref: (8, tile_n) f32.
    i = pl.program_id(0)          # B-tile index ("parallel")
    j = pl.program_id(1)          # N-tile index ("arbitrary" reduction)

    @pl.when(j == 0)
    def _():
        acc_ref[...] = jnp.zeros_like(acc_ref)

    x = x_ref[...].astype(jnp.float32)        # (tile_b, tile_n)
    y = y_ref[...].astype(jnp.float32)        # (tile_b, 1), broadcasts over N

    # Stable logits BCE: max(x,0) - x*y + log1p(exp(-|x|)).
    # Exactly two EUP pushes per element (exp + log1p); everything else VPU.
    term = jnp.maximum(x, 0.0) - x * y + jnp.log1p(jnp.exp(-jnp.abs(x)))

    def accumulate(t):
        # Fold rows onto the 8 sublanes: vreg-aligned reshape + pure VPU adds.
        # Keeps the accumulator a few KiB and off the store-slot critical path.
        acc_ref[...] += t.reshape(tile_b // 8, 8, tile_n).sum(axis=0)

    if need_row_mask or need_col_mask:
        conds = []
        if need_row_mask:
            conds.append(i == pl.num_programs(0) - 1)
        if need_col_mask:
            conds.append(j == pl.num_programs(1) - 1)
        is_edge = functools.reduce(jnp.logical_or, conds)

        @pl.when(is_edge)                       # ragged edge tile: mask garbage
        def _():
            t = term
            if need_row_mask:
                rows = i * tile_b + lax.broadcasted_iota(jnp.int32, t.shape, 0)
                t = jnp.where(rows < n_rows, t, 0.0)
            if need_col_mask:
                cols = j * tile_n + lax.broadcasted_iota(jnp.int32, t.shape, 1)
                t = jnp.where(cols < n_cols, t, 0.0)
            accumulate(t)

        @pl.when(jnp.logical_not(is_edge))      # interior tiles: unmasked path
        def _():
            accumulate(term)
    else:
        accumulate(term)

    @pl.when(j == pl.num_programs(1) - 1)
    def _():
        # One cross-lane/sublane reduction per B tile; lane-dense full-block
        # store (the wrapper only reads element [.., 0, 0]).
        s = jnp.sum(acc_ref[...])
        out_ref[...] = jnp.broadcast_to(s, out_ref.shape)


def jpz5mxl17_loss(x, y, lamd=1.0, *, tile_bytes=8 * 1024 * 1024):
    """JAX/Pallas equivalent of JPZ5MXL17_Loss.forward(x, y, lamd)."""
    assert x.ndim == 2, "x expected as (B, N)"
    B, N = x.shape
    y2 = jnp.reshape(y, (B, 1)).astype(jnp.float32)    # y.view((B, 1))

    itemsize = x.dtype.itemsize
    sub = {1: 32, 2: 16}.get(itemsize, 8)     # sublane packing per dtype width
    lanes_n = _round_up(N, 128)
    y_row_bytes = 128 * 4                     # (tile_b, 1) f32 pads lanes to 128

    if (lanes_n * itemsize + y_row_bytes) * sub <= tile_bytes:
        # Full-N blocks; tile only over B.
        tile_n = N
        row_cost = lanes_n * itemsize + y_row_bytes
        tile_b = (tile_bytes // row_cost // sub) * sub
        tile_b = max(sub, min(tile_b, _round_up(B, sub)))
    else:
        # Very wide rows: tile the lane axis too so the block stays bounded
        # and the pipeline stays 2-deep regardless of N.
        tile_b = sub
        tile_n = max(128, (tile_bytes // (sub * itemsize) // 128) * 128)
        tile_n = min(tile_n, lanes_n)

    grid_b = pl.cdiv(B, tile_b)
    grid_n = pl.cdiv(N, tile_n)
    need_row_mask = grid_b * tile_b != B       # ragged last row tile (no padding)
    need_col_mask = grid_n * tile_n != N       # ragged last column tile

    kernel = functools.partial(
        _bce_loss_kernel, tile_b=tile_b, tile_n=tile_n, n_rows=B, n_cols=N,
        need_row_mask=need_row_mask, need_col_mask=need_col_mask)

    lanes_tile_n = _round_up(tile_n, 128)
    vmem_needed = (2 * tile_b * lanes_tile_n * itemsize    # x double buffer
                   + 2 * tile_b * 128 * 4                  # y double buffer
                   + 8 * lanes_tile_n * 4                  # accumulator
                   + 2 * 8 * 128 * 4)                      # out double buffer
    vmem_limit = int(min(max(vmem_needed + (4 << 20), 20 << 20), 48 << 20))

    cost = pl.CostEstimate(
        flops=6 * B * N,
        transcendentals=2 * B * N,
        bytes_accessed=int(B * N * itemsize) + int(B * 4) + int(grid_b * 8 * 128 * 4),
    )

    partials = pl.pallas_call(
        kernel,
        out_shape=jax.ShapeDtypeStruct((grid_b, 8, 128), jnp.float32),
        grid=(grid_b, grid_n),
        in_specs=[
            pl.BlockSpec((tile_b, tile_n), lambda i, j: (i, j)),   # x tile (native dtype)
            pl.BlockSpec((tile_b, 1), lambda i, j: (i, 0)),        # matching y tile
        ],
        out_specs=pl.BlockSpec((1, 8, 128), lambda i, j: (i, 0, 0)),
        scratch_shapes=[pltpu.VMEM((8, tile_n), jnp.float32)],
        compiler_params=pltpu.CompilerParams(
            # B tiles are independent -> "parallel" (splits across v7x's 2 TCs);
            # N tiles form a running reduction into the scratch -> "arbitrary".
            dimension_semantics=("parallel", "arbitrary"),
            vmem_limit_bytes=vmem_limit),
        cost_estimate=cost,
    )(x, y2)

    scale = lamd / float(B * N)
    return scale * jnp.sum(partials[:, 0, 0])


if __name__ == "__main__":
    def reference(x, y, lamd):
        xf = x.astype(jnp.float32)
        p = jax.nn.sigmoid(xf)
        yf = jnp.reshape(y, (y.shape[0], 1)).astype(jnp.float32)
        return -jnp.mean(lamd * (yf * jnp.log(p) + (1.0 - yf) * jnp.log(1.0 - p)))

    key = jax.random.PRNGKey(0)

    # (B, N, dtype, lamd, tile_bytes): small shapes chosen to exercise
    #   A) multi B-tile grid + ragged-row mask with full-N blocks,
    #   B) N-tiled grid + ragged-column mask + j-axis accumulation,
    #   C) bf16 streaming with 16-row sublane packing, single big tile.
    tests = [
        (20, 32, jnp.float32, 1.0, 8 * 1024),
        (16, 200, jnp.float32, 1.0, 4 * 1024),
        (20, 64, jnp.bfloat16, 0.5, 8 * 1024 * 1024),
    ]
    for (B, N, dtype, lamd, tb) in tests:
        key, kx, ky = jax.random.split(key, 3)
        x = jax.random.normal(kx, (B, N), dtype=jnp.float32).astype(dtype)   # logits
        y = jax.random.bernoulli(ky, 0.5, (B,)).astype(jnp.float32)          # labels {0,1}
        loss = jpz5mxl17_loss(x, y, lamd=lamd, tile_bytes=tb)
        jax.block_until_ready(loss)
        ref = reference(x, y, lamd)
        assert jnp.allclose(loss, ref, rtol=1e-4, atol=1e-5), (B, N, str(dtype), loss, ref)

    print("KERNEL_OK")
</pallas_src>

<mosaic_0001>
module attributes {stable_mosaic.version = 11 : i64} {
  func.func @_bce_loss_kernel(%arg0: i32, %arg1: i32, %arg2: memref<8x32xf32, #tpu.memory_space<vmem>>, %arg3: memref<8x1xf32, #tpu.memory_space<vmem>>, %arg4: memref<1x8x128xf32, #tpu.memory_space<vmem>>, %arg5: memref<8x32xf32, #tpu.memory_space<vmem>>) attributes {dimension_semantics = [#tpu.dimension_semantics<parallel>, #tpu.dimension_semantics<arbitrary>], iteration_bounds = array<i64: 3, 1>, scalar_prefetch = 0 : i64, scratch_operands = 1 : i64, tpu.core_type = #tpu.core_type<tc>, window_params = [{transform_indices = @transform_0, window_bounds = array<i64: 8, 32>}, {transform_indices = @transform_1, window_bounds = array<i64: 8, 1>}, {transform_indices = @transform_2, window_bounds = array<i64: 1, 8, 128>}]} {
    %c0_i32 = arith.constant 0 : i32
    %0 = arith.cmpi eq, %arg1, %c0_i32 : i32
    %1 = arith.extui %0 : i1 to i32
    %c0_i32_0 = arith.constant 0 : i32
    %2 = arith.cmpi ne, %1, %c0_i32_0 : i32
    scf.if %2 {
      %cst_9 = arith.constant 0.000000e+00 : f32
      %25 = vector.broadcast %cst_9 : f32 to vector<8x32xf32>
      %c0_10 = arith.constant 0 : index
      %c0_11 = arith.constant 0 : index
      %26 = vector.load %arg5[%c0_10, %c0_11] : memref<8x32xf32, #tpu.memory_space<vmem>>, vector<8x32xf32>
      tpu.vector_store %arg5[%c0_10, %c0_11], %25 {strides = array<i32>} : memref<8x32xf32, #tpu.memory_space<vmem>>, vector<8x32xf32>,
    } else {
    }
    %c0 = arith.constant 0 : index
    %c0_1 = arith.constant 0 : index
    %3 = vector.load %arg2[%c0, %c0_1] : memref<8x32xf32, #tpu.memory_space<vmem>>, vector<8x32xf32>
    %c0_2 = arith.constant 0 : index
    %c0_3 = arith.constant 0 : index
    %4 = vector.load %arg3[%c0_2, %c0_3] : memref<8x1xf32, #tpu.memory_space<vmem>>, vector<8x1xf32>
    %cst = arith.constant 0.000000e+00 : f32
    %5 = vector.broadcast %cst : f32 to vector<8x32xf32>
    %6 = arith.maximumf %3, %5 : vector<8x32xf32>
    %7 = vector.broadcast %4 : vector<8x1xf32> to vector<8x32xf32>
    %8 = arith.mulf %3, %7 : vector<8x32xf32>
    %9 = arith.subf %6, %8 : vector<8x32xf32>
    %10 = math.absf %3 : vector<8x32xf32>
    %cst_4 = arith.constant 0.000000e+00 : f32
    %11 = vector.broadcast %cst_4 : f32 to vector<8x32xf32>
    %12 = arith.subf %11, %10 : vector<8x32xf32>
    %13 = math.exp %12 : vector<8x32xf32>
    %14 = math.log1p %13 : vector<8x32xf32>
    %15 = arith.addf %9, %14 : vector<8x32xf32>
    %c2_i32 = arith.constant 2 : i32
    %16 = arith.cmpi eq, %arg0, %c2_i32 : i32
    %17 = arith.extui %16 : i1 to i32
    %c0_i32_5 = arith.constant 0 : i32
    %18 = arith.cmpi ne, %17, %c0_i32_5 : i32
    scf.if %18 {
      %c8_i32 = arith.constant 8 : i32
      %25 = arith.muli %arg0, %c8_i32 : i32
      %26 = tpu.iota {dimensions = array<i32: 0>} : vector<8x32xi32>
      %27 = vector.broadcast %25 : i32 to vector<8x32xi32>
      %28 = arith.addi %27, %26 : vector<8x32xi32>
      %c20_i32 = arith.constant 20 : i32
      %29 = vector.broadcast %c20_i32 : i32 to vector<8x32xi32>
      %30 = arith.cmpi slt, %28, %29 : vector<8x32xi32>
      %cst_9 = arith.constant 0.000000e+00 : f32
      %31 = vector.broadcast %cst_9 : f32 to vector<8x32xf32>
      %32 = arith.select %30, %15, %31 : vector<8x32xi1>, vector<8x32xf32>
      %c0_10 = arith.constant 0 : index
      %c0_11 = arith.constant 0 : index
      %33 = vector.load %arg5[%c0_10, %c0_11] : memref<8x32xf32, #tpu.memory_space<vmem>>, vector<8x32xf32>
      %34 = vector.shape_cast %32 : vector<8x32xf32> to vector<1x8x32xf32>
      %cst_12 = arith.constant dense<0.000000e+00> : vector<8x32xf32>
      %35 = vector.multi_reduction <add>, %34, %cst_12 [0] : vector<1x8x32xf32> to vector<8x32xf32>
      %36 = arith.addf %33, %35 : vector<8x32xf32>
      %c0_13 = arith.constant 0 : index
      %c0_14 = arith.constant 0 : index
      %37 = vector.load %arg5[%c0_13, %c0_14] : memref<8x32xf32, #tpu.memory_space<vmem>>, vector<8x32xf32>
      tpu.vector_store %arg5[%c0_13, %c0_14], %36 {strides = array<i32>} : memref<8x32xf32, #tpu.memory_space<vmem>>, vector<8x32xf32>,
    } else {
    }
    %true = arith.constant true
    %19 = arith.xori %16, %true : i1
    %20 = arith.extui %19 : i1 to i32
    %c0_i32_6 = arith.constant 0 : i32
    %21 = arith.cmpi ne, %20, %c0_i32_6 : i32
    scf.if %21 {
      %c0_9 = arith.constant 0 : index
      %c0_10 = arith.constant 0 : index
      %25 = vector.load %arg5[%c0_9, %c0_10] : memref<8x32xf32, #tpu.memory_space<vmem>>, vector<8x32xf32>
      %26 = vector.shape_cast %15 : vector<8x32xf32> to vector<1x8x32xf32>
      %cst_11 = arith.constant dense<0.000000e+00> : vector<8x32xf32>
      %27 = vector.multi_reduction <add>, %26, %cst_11 [0] : vector<1x8x32xf32> to vector<8x32xf32>
      %28 = arith.addf %25, %27 : vector<8x32xf32>
      %c0_12 = arith.constant 0 : index
      %c0_13 = arith.constant 0 : index
      %29 = vector.load %arg5[%c0_12, %c0_13] : memref<8x32xf32, #tpu.memory_space<vmem>>, vector<8x32xf32>
      tpu.vector_store %arg5[%c0_12, %c0_13], %28 {strides = array<i32>} : memref<8x32xf32, #tpu.memory_space<vmem>>, vector<8x32xf32>,
    } else {
    }
    %c0_i32_7 = arith.constant 0 : i32
    %22 = arith.cmpi eq, %arg1, %c0_i32_7 : i32
    %23 = arith.extui %22 : i1 to i32
    %c0_i32_8 = arith.constant 0 : i32
    %24 = arith.cmpi ne, %23, %c0_i32_8 : i32
    scf.if %24 {
      %c0_9 = arith.constant 0 : index
      %c0_10 = arith.constant 0 : index
      %25 = vector.load %arg5[%c0_9, %c0_10] : memref<8x32xf32, #tpu.memory_space<vmem>>, vector<8x32xf32>
      %26 = vector.shape_cast %25 : vector<8x32xf32> to vector<1x8x32xf32>
      %cst_11 = arith.constant dense<0.000000e+00> : vector<1xf32>
      %27 = vector.multi_reduction <add>, %26, %cst_11 [1, 2] : vector<1x8x32xf32> to vector<1xf32>
      %28 = vector.shape_cast %27 : vector<1xf32> to vector<1x1x1xf32>
      %29 = vector.extract %28[0, 0, 0] : f32 from vector<1x1x1xf32>
      %30 = vector.broadcast %29 : f32 to vector<1x8x128xf32>
      %c0_12 = arith.constant 0 : index
      %c0_13 = arith.constant 0 : index
      %c0_14 = arith.constant 0 : index
      %31 = vector.load %arg4[%c0_12, %c0_13, %c0_14] : memref<1x8x128xf32, #tpu.memory_space<vmem>>, vector<1x8x128xf32>
      tpu.vector_store %arg4[%c0_12, %c0_13, %c0_14], %30 {strides = array<i32>} : memref<1x8x128xf32, #tpu.memory_space<vmem>>, vector<1x8x128xf32>,
    } else {
    }
    return
  }
  func.func @transform_0(%arg0: i32, %arg1: i32) -> (i32, i32) {
    %c0_i32 = arith.constant 0 : i32
    return %arg0, %arg1 : i32, i32
  }
  func.func @transform_1(%arg0: i32, %arg1: i32) -> (i32, i32) {
    %c0_i32 = arith.constant 0 : i32
    %c0_i32_0 = arith.constant 0 : i32
    return %arg0, %c0_i32 : i32, i32
  }
  func.func @transform_2(%arg0: i32, %arg1: i32) -> (i32, i32, i32) {
    %c0_i32 = arith.constant 0 : i32
    %c0_i32_0 = arith.constant 0 : i32
    %c0_i32_1 = arith.constant 0 : i32
    return %arg0, %c0_i32, %c0_i32_0 : i32, i32, i32
  }
}

</mosaic_0001>

<bundles_post_ra>
// kernel: tpu_custom_call.1
= control target key start
LH: loop header
LB: loop body
LE: loop exit
PB: predicated region body
PF: predicated region fallthrough
CT: control target
= control target key end

     0   :  { %7 = vsyncpa [#allocation4], 0  ;;  %s643_s0 = inlined_call_operand.vmem [shape: f32[20,32], index: 0, kind: input, shape index: {}]   ;;  %s644_s1 = inlined_call_operand.vmem [shape: f32[20,1], index: 1, kind: input, shape index: {}]   ;;  %s645_s2 = inlined_call_operand.hbm [shape: f32[3,8,128], index: 2, kind: output, shape index: {}]  }
   0x1   :  { %9 = vsyncpa [#allocation4 + $0x1], 0  ;;  %s525_s9 = smov 0   ;;  %s527_s10 = smov 0  }
   0x2   :  { %s529_s11 = smov 0   ;;  %s531_s12 = smov 0  }
   0x3   :  { %s533_s13 = smov 0   ;;  %s535_s14 = smov 0  }
   0x4 LB: > { %s349_s15 = sadd.s32 4294967295, %s506_s14   ;;  %s350_s16 = sadd.s32 4294967294, %s506_s14   ;;  %s506_s14 = sphi %s535_s14, %s15_s14   ;;  %s502_s13 = sphi %s533_s13, %s652_s13   ;;  %s498_s12 = sphi %s531_s12, %s651_s12   ;;  %s494_s11 = sphi %s529_s11, %s650_s11   ;;  %s490_s10 = sphi %s527_s10, %s649_s10   ;;  %s486_s9 = sphi %s525_s9, %s648_s9  }
   0x5   : > { %s27_s17 = sadd.s32 1, %s502_s13  ;;  %s88_s18 = sadd.s32 1, %s494_s11 }
   0x6   : > { %p29_p0 = scmp.ge.s32.totalorder %s27_s17, 3  ;;  %p98_p1 = scmp.ne.s32.totalorder %s494_s11, %s490_s10 }
   0x7   : > { %p99_p2 = scmp.eq.s32.totalorder %s349_s15, 2  ;;  %p104_p3 = scmp.ne.s32.totalorder %s490_s10, %s486_s9 }
   0x8   : > { %s654_s17 = smov (%p29_p0, %s27_s17), 0  ;;  %p105_p5 = scmp.eq.s32.totalorder %s350_s16, 2 }
   0x9   : > { %p565_p4 = por %p99_p2, %p98_p1  ;;  %s85_s20 = ssub.s32 %s502_s13, %s654_s17 }
   0xa   : > { %p353_p6 = scmp.ge.s32.totalorder %s506_s14, 1  ;;  %p86_p7 = scmp.eq.s32.totalorder %s85_s20, 0 }
   0xb   : > { %p572_p8 = por %p105_p5, %p104_p3  ;;  %p140_p9 = scmp.lt.s32.totalorder %s506_s14, 4 }
   0xc   : > { %s578_s22 = scalar_select %p86_p7, %s494_s11, %s88_s18  }
   0xd   : > { %p141_p10 = pnand %p353_p6, %p140_p9 }
   0xe   : > { %p168_p11 = scmp.lt.s32.totalorder (!%p141_p10), %s498_s12, 2  ;;  %s165_s23 = sand.u32 (!%p141_p10), 1, %s490_s10  }
   0xf   : > { %144 = sbr.rel (%p141_p10) target bundleno = 357 (0x165), region = 28  ;;  %s584_s24 = sshll.u32 (!%p141_p10), %s165_s23, 3 }
  0x10   : > { %s167_s5 = scalar_lea.vmem (!%p141_p10), [#allocation3], %s584_s24  ;;  %p357_p12 = scmp.ne.s32.totalorder (!%p141_p10), %s498_s12, 2 }
  0x14   : > { %v508_v0 = vmov 0   ;;  %s169_s25 = scalar_select %p168_p11, %s498_s12, 2  ;;  %vm183_vm0 = vcmask 261120   ;;  %v509_v6 = vmov 0.0  }
  0x15   : > { %423 = vset.pattern.permute.xlu0 %v508_v0  ;;  %184 = vst.msk [vmem:[#allocation2] sm:$0xff] %vm183_vm0, %v509_v6  ;;  %s358_s6 = sshll.u32 (!%p357_p12), %s498_s12, 3 }
  0x16   : > { %s355_s26 = sshll.u32 %s169_s25, 3 }
  0x17   : > { %s178_s29 = scalar_lea.vmem %s644_s1, %s355_s26  ;;  %s174_s4 = scalar_lea.vmem %s643_s0, %s355_s26 }
  0x18   : > { %v186_v1 = vld [vmem:[%s178_s29] sm:$0xff] }
  0x19   : > { %190 = vperm.xlu0 %423, %v186_v1   ;;  %v185_v2 = vld [vmem:[%s174_s4] sm:$0xff] }
  0x1a   : > { %v195_v3 = vand.u32 2147483647, %v185_v2  ;;  %v187_v15 = vmax.f32 %v185_v2, 0.0 }
  0x1c   : > { %v196_v4 = vsub.f32 0.0, %v195_v3 }
  0x1e   : > { %v197_v5 = vmul.f32 1.442695, %v196_v4 }
  0x20   : > { %424 = vpow2.f32 %v197_v5 }
  0x26   : > { %v425_v7 = vpop.eup %424 }
  0x27   : > { %v199_v8 = vadd.f32 1.0, %v425_v7  ;;  %v202_v9 = vmul.f32 -0.5, %v425_v7  ;;  %v205_v12 = vand.u32 2147483647, %v425_v7 }
  0x29   : > { %426 = vlog2.f32 %v199_v8  ;;  %v203_v10 = vadd.f32 1.0, %v202_v9  ;;  %vm206_vm1 = vcmp.lt.f32.partialorder %v205_v12, 0.0004427343 }
  0x2b   : > { %v204_v14 = vmul.f32 %v425_v7, %v203_v10 }
  0x2f   : > { %v427_v11 = vpop.eup %426 }
  0x30   : > { %v201_v13 = vmul.f32 0.6931472, %v427_v11 }
  0x32   : > { %v207_v18 = vsel %vm206_vm1, %v204_v14, %v201_v13 }
  0x8b   : > { %v191_v16 = vpop.permute.xlu0 %190 }
  0x8c   : > { %v193_v17 = vmul.f32 %v191_v16, %v185_v2  ;;  %212 = sbr.rel (%p357_p12) target bundleno = 156 (0x9c), region = 36 }
  0x8e   : > { %v194_v19 = vsub.f32 %v187_v15, %v193_v17 }
  0x90   : > { %v208_v20 = vadd.f32 %v207_v18, %v194_v19 }
  0x91   : > { %v214_v21 = vlaneseq  ;;  %v216_v22 = vstv %s358_s6  ;;  %v220_v25 = vld [vmem:[#allocation2] sm:$0xff] }
  0x93   : > { %v215_v23 = vshrl.u32 %v214_v21, 7 }
  0x95   : > { %v217_v24 = vadd.s32 %v216_v22, %v215_v23 }
  0x97   : > { %vm218_vm2 = vcmp.lt.s32.totalorder %v217_v24, 20 }
  0x98   : > { %v219_v26 = vsel %vm218_vm2, %v208_v20, 0.0 }
  0x99   : > { %v222_v27 = vadd.f32 %v220_v25, %v219_v26 }
  0x9b   : > { %224 = vst.msk [vmem:[#allocation2] sm:$0xff] %vm183_vm0, %v222_v27 }
  0x9c PF: > { %p359_p13 = scmp.eq.s32.totalorder %s498_s12, 2 }
  0x9e   : > { %228 = sbr.rel (%p359_p13) target bundleno = 167 (0xa7), region = 40 }
  0xa3   : > { %v229_v28 = vld [vmem:[#allocation2] sm:$0xff] }
  0xa4   : > { %v231_v29 = vadd.f32 %v229_v28, %v208_v20 }
  0xa6   : > { %233 = vst.msk [vmem:[#allocation2] sm:$0xff] %vm183_vm0, %v231_v29 }
  0xa7 PF: > { %s361_s7 = sshll.u32 %s498_s12, 3  ;;  %s264_s18 = sshll.u32 %s167_s5, 4  ;;  %s265_s18 = int_to_ptr.vmem [resolvable:$true] %s264_s18 }
  0xa8   : > { %s262_s16 = scalar_lea.hbm %s645_s2, %s361_s7  ;;  %s252_s26 = scalar_lea.sflag [#allocation4], %s165_s23 }
  0xa9   : > { %s266_s20 = sshll.u32 %s262_s16, 4  ;;  %s448_s30 = scalar_lea.hbm %s645_s2, 24  ;;  %s267_s20 = int_to_ptr.hbm [resolvable:$true] %s266_s20 }
  0xaa   : > { %s442_s27 = sshra.s32 %s267_s20, 4  ;;  %s443_s27 = int_to_ptr.hbm [resolvable:$true] %s442_s27 }
  0xab   : > { %s444_s28 = scalar_lea.hbm %s443_s27, 8  ;;  %p449_p3 = scmp.lt.s32.totalorder %s443_s27, %s645_s2 }
  0xac   : > { %p445_p0 = scmp.ne.s32.totalorder %s443_s27, %s444_s28  ;;  %p450_p5 = scmp.lt.s32.totalorder %s448_s30, %s444_s28 }
  0xad   : > { %v237_v30 = vld [vmem:[#allocation2] sm:$0xff] }
  0xae   : > { %v239_v31 = vsel %vm183_vm0, %v237_v30, 0.0  ;;  %p446_p1 = pnand %p445_p0, %p565_p4  ;;  %p451_p6 = por %p450_p5, %p449_p3 }
  0xaf   : > { %240 = vadd.xlane.f32.xlu0 %v239_v31 }
  0xb0   : > { %p447_p2 = pneg %p446_p1 }
  0xb2   : > { %p452_p7 = pnand %p451_p6, %p447_p2 }
 0x122   : > { %v241_v32 = vpop.xlane.xlu0 %240 }
 0x123   : > { %v242_v33 = vrot.slane %v241_v32, 4 }
 0x125   : > { %v243_v34 = vadd.f32 %v242_v33, %v241_v32 }
 0x127   : > { %v244_v35 = vrot.slane %v243_v34, 2 }
 0x129   : > { %v245_v36 = vadd.f32 %v244_v35, %v243_v34 }
 0x12b   : > { %v246_v37 = vrot.slane %v245_v36, 1 }
 0x12d   : > { %v247_v38 = vadd.f32 %v246_v37, %v245_v36 }
 0x12f   : > { %364 = vpush %v247_v38 }
 0x160   : > { %s365_s25 = spop %364 }
 0x161   : > { %v249_v39 = vstv %s365_s25 }
 0x162   : > { %250 = vst [vmem:[%s167_s5] sm:$0xff] %v249_v39 }
 0x163   : > { %455 = shalt.err (!%p452_p7)
}
 0x164   : > { %366 = dma.vmem_to_hbm [thread:$0]  (%p565_p4), %s265_s18, 128, %s267_s20, %s252_s26  }
 0x165 PF: > { %p372_p9 = scmp.ge.s32.totalorder %s506_s14, 2  ;;  %s278_s23 = sand.u32 1, %s486_s9  }
 0x166   : > { %s279_s24 = scalar_lea.sflag [#allocation4], %s278_s23 }
 0x167   : > { %p369_p10 = pnand %p372_p9, %p572_p8 }
 0x169   : > { %p370_p11 = pneg %p369_p10 }
 0x16b   : > { %481 = dma.done.wait (%p370_p11), %s279_s24, 128  }
 0x16c   : > { %483 = vsyncadd (%p370_p11), %s279_s24, 4294967168  ;;  %s15_s14 = sadd.s32 1, %s506_s14   ;;  %s648_s9 = smov %s490_s10 }
 0x16d   : > { %p12_p12 = scmp.ge.s32.totalorder %s15_s14, 5   ;;  %s649_s10 = smov %s494_s11 }
 0x16e   : > { %s650_s11 = smov %s578_s22  ;;  %s651_s12 = smov %s502_s13 }
 0x16f   : > { %s652_s13 = smov %s654_s17  ;;  %14 = sbr.rel (!%p12_p12) target bundleno = 4 (0x4), region = 82 }
 0x174   :  { %285 = vsyncpa [#allocation4], 1 }
 0x175   :  { %287 = vsyncpa [#allocation4 + $0x1], 1 }

</bundles_post_ra>
